<compile_context>
chip_gen: v7x
topology: tpu7x:2x2x1
jax: 0.10.0
libtpu: 0.0.40
codegen_flags: <defaults>
</compile_context>

<pallas_src>
import jax
import jax.numpy as jnp
from jax.experimental import pallas as pl
from jax.experimental.pallas import tpu as pltpu


# --------------------------------------------------------------------------
# Hardware introspection (defensive: falls back to v5e/v6e-like defaults).
# --------------------------------------------------------------------------
def _tpu_topology():
    """Returns (physical VMEM bytes per core, TensorCores per chip)."""
    vmem = 128 * 1024 * 1024                     # v5e / v6e default
    try:
        info = pltpu.get_tpu_info()
        vmem = int(getattr(info, "vmem_capacity_bytes", vmem))
    except Exception:
        pass
    kind = ""
    try:
        kind = jax.devices()[0].device_kind.lower()
    except Exception:
        pass
    # v7x is the only generation with 64 MiB VMEM / 2 TensorCores per chip.
    cores = 2 if ("v7" in kind or vmem <= 80 * 1024 * 1024) else 1
    return vmem, cores


def _use_f32_blend(act_dtype):
    """Blend in f32 for f32 inputs and on chips without bf16 VALU/EUP (v5e-)."""
    if jnp.dtype(act_dtype) == jnp.dtype(jnp.float32):
        return True
    kind = ""
    try:
        kind = jax.devices()[0].device_kind.lower()
    except Exception:
        return True
    return any(v in kind for v in ("v2", "v3", "v4", "v5"))


# --------------------------------------------------------------------------
# Tile sizing: full VMEM footprint (I/O + f32 temporaries + weights), with
# sublane / lane padding, kept under the per-generation scoped-VMEM limit.
# --------------------------------------------------------------------------
def _choose_tile_hw(hw, c, itemsize, vmem_limit_bytes, need_f32_acts):
    pack = 8 * max(4 // itemsize, 1)             # 8 (f32) / 16 (bf16) / 32 (i8)
    c_pad = -(-c // pack) * pack                 # sublane-padded channel count

    # Per pixel-lane cost of one tile column:
    io_per_lane = 2 * 3 * c_pad * itemsize       # x, f2, out; double-buffered
    # f32 temporaries: logits + sigmoid, optional f32 casts of x/f2, blend temps
    n_f32_tmps = 2 + (2 if need_f32_acts else 0) + 2
    tmp_per_lane = n_f32_tmps * c_pad * 4
    per_lane = io_per_lane + tmp_per_lane

    # Grid-invariant buffers: Wx, Wf (double-buffered) + bias, lane-padded.
    c_lanes = max(-(-c // 128) * 128, 128)
    fixed = 2 * 2 * c_pad * c_lanes * 4 + 2 * c_pad * 128 * 4

    budget = int(vmem_limit_bytes * 0.8) - fixed  # headroom for compiler scratch
    max_hw = max(budget // per_lane, 128)
    if hw <= max_hw:
        return hw                                # full extent -> always legal
    return max((max_hw // 128) * 128, 128)       # lane-aligned tile


# --------------------------------------------------------------------------
# Kernel
# --------------------------------------------------------------------------
def _make_kernel(c_in, use_vpu_gate, blend_in_f32):
    def kernel(x_ref, f2_ref, wx_ref, wf_ref, b_ref, o_ref):
        # x_ref, f2_ref, o_ref : (1, C, T)  -- pixel axis T is the lane axis
        # wx_ref, wf_ref       : (C, C)     -- halves of the 1x1-conv weight
        # b_ref                : (C, 1)     -- f32 bias, broadcast along lanes
        x = x_ref[0]                              # (C, T), native dtype
        f2 = f2_ref[0]                            # (C, T), native dtype

        need_f32_acts = use_vpu_gate or blend_in_f32
        if need_f32_acts:
            xf = x.astype(jnp.float32)
            ff = f2.astype(jnp.float32)

        if use_vpu_gate:
            # Small-C path: unrolled broadcast sum on the VPU (a (C,C)@(C,T)
            # matmul with C < sublane pack wastes the MXU and forces relayouts).
            logits = jnp.broadcast_to(b_ref[...], (x.shape[0], x.shape[1]))
            for ci in range(c_in):
                logits = (logits
                          + wx_ref[:, ci:ci + 1] * xf[ci:ci + 1, :]
                          + wf_ref[:, ci:ci + 1] * ff[ci:ci + 1, :])
        else:
            # MXU path: two small matmuls, f32 accumulation (bf16 inputs hit
            # the bf16 MXU on v6e/v7x).
            logits = (jnp.dot(wx_ref[...], x, preferred_element_type=jnp.float32)
                      + jnp.dot(wf_ref[...], f2, preferred_element_type=jnp.float32)
                      + b_ref[...])

        w = jax.nn.sigmoid(logits)                # f32 (EUP)

        if blend_in_f32:
            o_ref[0] = (xf + w * (ff - xf)).astype(o_ref.dtype)
        else:
            # bf16 blend on v6e/v7x: no full-tile f32 casts of x/f2.
            o_ref[0] = x + w.astype(x.dtype) * (f2 - x)

    return kernel


# --------------------------------------------------------------------------
# Wrapper
# --------------------------------------------------------------------------
def gated_fusion(x, f2, conv_w, conv_b, *, tile_hw=None):
    """x, f2: (N, C, H, W).  conv_w: (C, 2C, 1, 1).  conv_b: (C,)."""
    N, C, H, W = x.shape
    assert f2.shape == x.shape
    assert conv_w.shape == (C, 2 * C, 1, 1)
    HW = H * W
    itemsize = x.dtype.itemsize

    phys_vmem, n_cores = _tpu_topology()
    if phys_vmem >= 128 * 1024 * 1024:
        vmem_limit = 64 * 1024 * 1024             # v5e / v6e: plenty of headroom
    else:
        vmem_limit = min(48 * 1024 * 1024, (phys_vmem * 3) // 4)   # v7x: 64 MiB

    pack = 8 * max(4 // itemsize, 1)
    use_vpu_gate = C < pack
    blend_in_f32 = _use_f32_blend(x.dtype)
    need_f32_acts = use_vpu_gate or blend_in_f32

    auto_tile = tile_hw is None
    if auto_tile:
        tile_hw = _choose_tile_hw(HW, C, itemsize, vmem_limit, need_f32_acts)
    tile_hw = min(tile_hw, HW)

    # v7x has 2 TensorCores: guarantee >= 2 programs on a parallel axis so a
    # single "fits-in-one-tile" image does not leave one core idle.
    if auto_tile and n_cores >= 2 and HW > 128:
        if N * ((HW + tile_hw - 1) // tile_hw) < 2:
            half = (HW + 1) // 2
            tile_hw = max(128, ((half + 127) // 128) * 128)

    # Free reshapes: NCHW is pixel-fast in memory; no transpose/pad/copy.
    x3 = x.reshape(N, C, HW)
    f3 = f2.reshape(N, C, HW)

    # Split the 1x1-conv weight.  MXU path keeps the activation dtype (bf16
    # MXU on v6e/v7x); the small-C VPU path keeps f32 weights.
    w2d = conv_w.reshape(C, 2 * C)
    weight_dtype = jnp.float32 if use_vpu_gate else x.dtype
    wx = w2d[:, :C].astype(weight_dtype)          # (C_out, C_in)
    wf = w2d[:, C:].astype(weight_dtype)          # (C_out, C_in)
    b = conv_b.reshape(C, 1).astype(jnp.float32)

    grid = (N, pl.cdiv(HW, tile_hw))              # ragged tail masked by Pallas

    cost = pl.CostEstimate(
        flops=4 * N * C * C * HW + 3 * N * C * HW,
        transcendentals=N * C * HW,
        bytes_accessed=3 * N * C * HW * itemsize
                       + 2 * C * C * jnp.dtype(weight_dtype).itemsize + 4 * C,
    )

    out3 = pl.pallas_call(
        _make_kernel(C, use_vpu_gate, blend_in_f32),
        out_shape=jax.ShapeDtypeStruct((N, C, HW), x.dtype),
        grid=grid,
        in_specs=[
            pl.BlockSpec((1, C, tile_hw), lambda n, t: (n, 0, t)),   # x
            pl.BlockSpec((1, C, tile_hw), lambda n, t: (n, 0, t)),   # f2
            pl.BlockSpec((C, C), lambda n, t: (0, 0)),               # Wx
            pl.BlockSpec((C, C), lambda n, t: (0, 0)),               # Wf
            pl.BlockSpec((C, 1), lambda n, t: (0, 0)),               # bias
        ],
        out_specs=pl.BlockSpec((1, C, tile_hw), lambda n, t: (n, 0, t)),
        compiler_params=pltpu.CompilerParams(
            dimension_semantics=("parallel", "parallel"),
            vmem_limit_bytes=vmem_limit,
        ),
        cost_estimate=cost,
    )(x3, f3, wx, wf, b)

    return out3.reshape(N, C, H, W)


# --------------------------------------------------------------------------
# Pure-JAX reference matching the PyTorch forward.
# --------------------------------------------------------------------------
def _reference(x, f2, conv_w, conv_b):
    N, C, H, W = x.shape
    fusion = jnp.concatenate([x, f2], axis=1)                     # (N, 2C, H, W)
    w2d = conv_w.reshape(C, 2 * C)
    logits = jnp.einsum("nchw,oc->nohw", fusion.astype(jnp.float32), w2d) \
        + conv_b[None, :, None, None]
    weight = jax.nn.sigmoid(logits)
    xf = x.astype(jnp.float32)
    ff = f2.astype(jnp.float32)
    return xf * (1.0 - weight) + ff * weight


def _make_params(key, c):
    kw, kb = jax.random.split(key)
    fan_in = 2 * c
    bound = 1.0 / (fan_in ** 0.5)
    conv_w = jax.random.uniform(kw, (c, 2 * c, 1, 1), minval=-bound, maxval=bound,
                                dtype=jnp.float32)
    conv_b = jax.random.uniform(kb, (c,), minval=-bound, maxval=bound,
                                dtype=jnp.float32)
    return conv_w, conv_b


if __name__ == "__main__":
    key = jax.random.PRNGKey(0)
    k1, k2, k3, k4, k5 = jax.random.split(key, 5)

    # ---- Test 1: demo shapes (N=2, C=4, 16x16), f32, small-C VPU gate path.
    N, C, H, W = 2, 4, 16, 16
    x = jax.random.normal(k1, (N, C, H, W), dtype=jnp.float32)
    f2 = jax.random.normal(k2, (N, C, H, W), dtype=jnp.float32)
    conv_w, conv_b = _make_params(k3, C)

    out = jax.block_until_ready(gated_fusion(x, f2, conv_w, conv_b))
    ref = _reference(x, f2, conv_w, conv_b)
    assert out.shape == (N, C, H, W)
    assert jnp.allclose(out, ref, atol=1e-5, rtol=1e-5), \
        float(jnp.max(jnp.abs(out - ref)))

    # ---- Test 2: ragged pixel tail (HW=144, tile_hw=128 -> 2 tiles, masked).
    xr = jax.random.normal(k4, (1, C, 12, 12), dtype=jnp.float32)
    fr = jax.random.normal(k5, (1, C, 12, 12), dtype=jnp.float32)
    out_r = jax.block_until_ready(gated_fusion(xr, fr, conv_w, conv_b, tile_hw=128))
    ref_r = _reference(xr, fr, conv_w, conv_b)
    assert jnp.allclose(out_r, ref_r, atol=1e-5, rtol=1e-5), \
        float(jnp.max(jnp.abs(out_r - ref_r)))

    # ---- Test 3: C=8 exercises the MXU gate path.
    C8 = 8
    x8 = jax.random.normal(k1, (1, C8, 8, 16), dtype=jnp.float32)
    f8 = jax.random.normal(k2, (1, C8, 8, 16), dtype=jnp.float32)
    w8, b8 = _make_params(k3, C8)
    out_8 = jax.block_until_ready(gated_fusion(x8, f8, w8, b8))
    ref_8 = _reference(x8, f8, w8, b8)
    assert jnp.allclose(out_8, ref_8, atol=1e-5, rtol=1e-5), \
        float(jnp.max(jnp.abs(out_8 - ref_8)))

    # ---- Test 4: bf16 activations (bf16 blend on v6e/v7x, f32 blend on v5e).
    xb = x.astype(jnp.bfloat16)
    fb = f2.astype(jnp.bfloat16)
    out_b = jax.block_until_ready(gated_fusion(xb, fb, conv_w, conv_b))
    ref_b = _reference(xb, fb, conv_w, conv_b)
    assert out_b.dtype == jnp.bfloat16
    assert jnp.allclose(out_b.astype(jnp.float32), ref_b, atol=1e-1, rtol=5e-2), \
        float(jnp.max(jnp.abs(out_b.astype(jnp.float32) - ref_b)))

    print("KERNEL_OK")
</pallas_src>

<mosaic_0001>
module attributes {stable_mosaic.version = 11 : i64} {
  func.func @kernel(%arg0: i32, %arg1: i32, %arg2: memref<1x4x256xf32, #tpu.memory_space<vmem>>, %arg3: memref<1x4x256xf32, #tpu.memory_space<vmem>>, %arg4: memref<4x4xf32, #tpu.memory_space<vmem>>, %arg5: memref<4x4xf32, #tpu.memory_space<vmem>>, %arg6: memref<4x1xf32, #tpu.memory_space<vmem>>, %arg7: memref<1x4x256xf32, #tpu.memory_space<vmem>>) attributes {dimension_semantics = [#tpu.dimension_semantics<parallel>, #tpu.dimension_semantics<parallel>], iteration_bounds = array<i64: 2, 1>, scalar_prefetch = 0 : i64, scratch_operands = 0 : i64, tpu.core_type = #tpu.core_type<tc>, window_params = [{transform_indices = @transform_0, window_bounds = array<i64: 1, 4, 256>}, {transform_indices = @transform_1, window_bounds = array<i64: 1, 4, 256>}, {pipeline_mode = #tpu.pipeline_mode<synchronous>, transform_indices = @transform_2, window_bounds = array<i64: 4, 4>}, {pipeline_mode = #tpu.pipeline_mode<synchronous>, transform_indices = @transform_3, window_bounds = array<i64: 4, 4>}, {pipeline_mode = #tpu.pipeline_mode<synchronous>, transform_indices = @transform_4, window_bounds = array<i64: 4, 1>}, {transform_indices = @transform_5, window_bounds = array<i64: 1, 4, 256>}]} {
    %c0 = arith.constant 0 : index
    %c0_0 = arith.constant 0 : index
    %c0_1 = arith.constant 0 : index
    %0 = vector.load %arg2[%c0, %c0_0, %c0_1] : memref<1x4x256xf32, #tpu.memory_space<vmem>>, vector<1x4x256xf32>
    %1 = vector.shape_cast %0 : vector<1x4x256xf32> to vector<4x256xf32>
    %c0_2 = arith.constant 0 : index
    %c0_3 = arith.constant 0 : index
    %c0_4 = arith.constant 0 : index
    %2 = vector.load %arg3[%c0_2, %c0_3, %c0_4] : memref<1x4x256xf32, #tpu.memory_space<vmem>>, vector<1x4x256xf32>
    %3 = vector.shape_cast %2 : vector<1x4x256xf32> to vector<4x256xf32>
    %c0_5 = arith.constant 0 : index
    %c0_6 = arith.constant 0 : index
    %4 = vector.load %arg6[%c0_5, %c0_6] : memref<4x1xf32, #tpu.memory_space<vmem>>, vector<4x1xf32>
    %5 = vector.shape_cast %4 : vector<4x1xf32> to vector<4x1xf32>
    %6 = vector.broadcast %5 : vector<4x1xf32> to vector<4x256xf32>
    %c0_7 = arith.constant 0 : index
    %c0_8 = arith.constant 0 : index
    %7 = vector.load %arg4[%c0_7, %c0_8] : memref<4x4xf32, #tpu.memory_space<vmem>>, vector<4x1xf32>
    %8 = vector.extract_strided_slice %1 {offsets = [0, 0], sizes = [1, 256], strides = [1, 1]} : vector<4x256xf32> to vector<1x256xf32>
    %9 = vector.broadcast %7 : vector<4x1xf32> to vector<4x256xf32>
    %10 = vector.broadcast %8 : vector<1x256xf32> to vector<4x256xf32>
    %11 = arith.mulf %9, %10 : vector<4x256xf32>
    %12 = arith.addf %6, %11 : vector<4x256xf32>
    %c0_9 = arith.constant 0 : index
    %c0_10 = arith.constant 0 : index
    %13 = vector.load %arg5[%c0_9, %c0_10] : memref<4x4xf32, #tpu.memory_space<vmem>>, vector<4x1xf32>
    %14 = vector.extract_strided_slice %3 {offsets = [0, 0], sizes = [1, 256], strides = [1, 1]} : vector<4x256xf32> to vector<1x256xf32>
    %15 = vector.broadcast %13 : vector<4x1xf32> to vector<4x256xf32>
    %16 = vector.broadcast %14 : vector<1x256xf32> to vector<4x256xf32>
    %17 = arith.mulf %15, %16 : vector<4x256xf32>
    %18 = arith.addf %12, %17 : vector<4x256xf32>
    %c0_11 = arith.constant 0 : index
    %c1 = arith.constant 1 : index
    %19 = vector.load %arg4[%c0_11, %c1] : memref<4x4xf32, #tpu.memory_space<vmem>>, vector<4x1xf32>
    %20 = vector.extract_strided_slice %1 {offsets = [1, 0], sizes = [1, 256], strides = [1, 1]} : vector<4x256xf32> to vector<1x256xf32>
    %21 = vector.broadcast %19 : vector<4x1xf32> to vector<4x256xf32>
    %22 = vector.broadcast %20 : vector<1x256xf32> to vector<4x256xf32>
    %23 = arith.mulf %21, %22 : vector<4x256xf32>
    %24 = arith.addf %18, %23 : vector<4x256xf32>
    %c0_12 = arith.constant 0 : index
    %c1_13 = arith.constant 1 : index
    %25 = vector.load %arg5[%c0_12, %c1_13] : memref<4x4xf32, #tpu.memory_space<vmem>>, vector<4x1xf32>
    %26 = vector.extract_strided_slice %3 {offsets = [1, 0], sizes = [1, 256], strides = [1, 1]} : vector<4x256xf32> to vector<1x256xf32>
    %27 = vector.broadcast %25 : vector<4x1xf32> to vector<4x256xf32>
    %28 = vector.broadcast %26 : vector<1x256xf32> to vector<4x256xf32>
    %29 = arith.mulf %27, %28 : vector<4x256xf32>
    %30 = arith.addf %24, %29 : vector<4x256xf32>
    %c0_14 = arith.constant 0 : index
    %c2 = arith.constant 2 : index
    %31 = vector.load %arg4[%c0_14, %c2] : memref<4x4xf32, #tpu.memory_space<vmem>>, vector<4x1xf32>
    %32 = vector.extract_strided_slice %1 {offsets = [2, 0], sizes = [1, 256], strides = [1, 1]} : vector<4x256xf32> to vector<1x256xf32>
    %33 = vector.broadcast %31 : vector<4x1xf32> to vector<4x256xf32>
    %34 = vector.broadcast %32 : vector<1x256xf32> to vector<4x256xf32>
    %35 = arith.mulf %33, %34 : vector<4x256xf32>
    %36 = arith.addf %30, %35 : vector<4x256xf32>
    %c0_15 = arith.constant 0 : index
    %c2_16 = arith.constant 2 : index
    %37 = vector.load %arg5[%c0_15, %c2_16] : memref<4x4xf32, #tpu.memory_space<vmem>>, vector<4x1xf32>
    %38 = vector.extract_strided_slice %3 {offsets = [2, 0], sizes = [1, 256], strides = [1, 1]} : vector<4x256xf32> to vector<1x256xf32>
    %39 = vector.broadcast %37 : vector<4x1xf32> to vector<4x256xf32>
    %40 = vector.broadcast %38 : vector<1x256xf32> to vector<4x256xf32>
    %41 = arith.mulf %39, %40 : vector<4x256xf32>
    %42 = arith.addf %36, %41 : vector<4x256xf32>
    %c0_17 = arith.constant 0 : index
    %c3 = arith.constant 3 : index
    %43 = vector.load %arg4[%c0_17, %c3] : memref<4x4xf32, #tpu.memory_space<vmem>>, vector<4x1xf32>
    %44 = vector.extract_strided_slice %1 {offsets = [3, 0], sizes = [1, 256], strides = [1, 1]} : vector<4x256xf32> to vector<1x256xf32>
    %45 = vector.broadcast %43 : vector<4x1xf32> to vector<4x256xf32>
    %46 = vector.broadcast %44 : vector<1x256xf32> to vector<4x256xf32>
    %47 = arith.mulf %45, %46 : vector<4x256xf32>
    %48 = arith.addf %42, %47 : vector<4x256xf32>
    %c0_18 = arith.constant 0 : index
    %c3_19 = arith.constant 3 : index
    %49 = vector.load %arg5[%c0_18, %c3_19] : memref<4x4xf32, #tpu.memory_space<vmem>>, vector<4x1xf32>
    %50 = vector.extract_strided_slice %3 {offsets = [3, 0], sizes = [1, 256], strides = [1, 1]} : vector<4x256xf32> to vector<1x256xf32>
    %51 = vector.broadcast %49 : vector<4x1xf32> to vector<4x256xf32>
    %52 = vector.broadcast %50 : vector<1x256xf32> to vector<4x256xf32>
    %53 = arith.mulf %51, %52 : vector<4x256xf32>
    %54 = arith.addf %48, %53 : vector<4x256xf32>
    %55 = arith.negf %54 : vector<4x256xf32>
    %56 = math.exp %55 : vector<4x256xf32>
    %cst = arith.constant 1.000000e+00 : f32
    %57 = vector.broadcast %cst : f32 to vector<4x256xf32>
    %58 = arith.addf %57, %56 : vector<4x256xf32>
    %59 = arith.divf %57, %58 : vector<4x256xf32>
    %60 = arith.subf %3, %1 : vector<4x256xf32>
    %61 = arith.mulf %59, %60 : vector<4x256xf32>
    %62 = arith.addf %1, %61 : vector<4x256xf32>
    %c0_20 = arith.constant 0 : index
    %c0_21 = arith.constant 0 : index
    %c0_22 = arith.constant 0 : index
    %63 = vector.load %arg7[%c0_20, %c0_21, %c0_22] : memref<1x4x256xf32, #tpu.memory_space<vmem>>, vector<1x4x256xf32>
    %64 = vector.shape_cast %63 : vector<1x4x256xf32> to vector<4x256xf32>
    %65 = vector.shape_cast %62 : vector<4x256xf32> to vector<1x4x256xf32>
    tpu.vector_store %arg7[%c0_20, %c0_21, %c0_22], %65 {strides = array<i32>} : memref<1x4x256xf32, #tpu.memory_space<vmem>>, vector<1x4x256xf32>,
    return
  }
  func.func @transform_0(%arg0: i32, %arg1: i32) -> (i32, i32, i32) {
    %c0_i32 = arith.constant 0 : i32
    %c0_i32_0 = arith.constant 0 : i32
    return %arg0, %c0_i32, %arg1 : i32, i32, i32
  }
  func.func @transform_1(%arg0: i32, %arg1: i32) -> (i32, i32, i32) {
    %c0_i32 = arith.constant 0 : i32
    %c0_i32_0 = arith.constant 0 : i32
    return %arg0, %c0_i32, %arg1 : i32, i32, i32
  }
  func.func @transform_2(%arg0: i32, %arg1: i32) -> (i32, i32) {
    %c0_i32 = arith.constant 0 : i32
    %c0_i32_0 = arith.constant 0 : i32
    %c0_i32_1 = arith.constant 0 : i32
    return %c0_i32, %c0_i32_0 : i32, i32
  }
  func.func @transform_3(%arg0: i32, %arg1: i32) -> (i32, i32) {
    %c0_i32 = arith.constant 0 : i32
    %c0_i32_0 = arith.constant 0 : i32
    %c0_i32_1 = arith.constant 0 : i32
    return %c0_i32, %c0_i32_0 : i32, i32
  }
  func.func @transform_4(%arg0: i32, %arg1: i32) -> (i32, i32) {
    %c0_i32 = arith.constant 0 : i32
    %c0_i32_0 = arith.constant 0 : i32
    %c0_i32_1 = arith.constant 0 : i32
    return %c0_i32, %c0_i32_0 : i32, i32
  }
  func.func @transform_5(%arg0: i32, %arg1: i32) -> (i32, i32, i32) {
    %c0_i32 = arith.constant 0 : i32
    %c0_i32_0 = arith.constant 0 : i32
    return %arg0, %c0_i32, %arg1 : i32, i32, i32
  }
}

</mosaic_0001>

<bundles_post_ra>
// kernel: tpu_custom_call.1
= control target key start
LH: loop header
LB: loop body
LE: loop exit
PB: predicated region body
PF: predicated region fallthrough
CT: control target
= control target key end

     0   :  { %s1515_s0 = inlined_call_operand.hbm [shape: f32[2,4,256], index: 0, kind: input, shape index: {}]   ;;  %s1516_s1 = inlined_call_operand.hbm [shape: f32[2,4,256], index: 1, kind: input, shape index: {}]   ;;  %s1517_s2 = inlined_call_operand.hbm [shape: f32[4,4], index: 2, kind: input, shape index: {}]   ;;  %s1518_s3 = inlined_call_operand.hbm [shape: f32[4,4], index: 3, kind: input, shape index: {}]   ;;  %s1519_s4 = inlined_call_operand.hbm [shape: f32[4,1], index: 4, kind: input, shape index: {}]   ;;  %s1520_s5 = inlined_call_operand.hbm [shape: f32[2,4,256], index: 5, kind: output, shape index: {}]  }
   0x1   :  { %1526 = sst [smem:[#allocation18_spill]] %s1517_s2 }
   0x2   :  { %1527 = sst [smem:[#allocation19_spill]] %s1518_s3 }
   0x3   :  { %1528 = sst [smem:[#allocation20_spill]] %s1519_s4 }
   0x4   :  { %10 = vsyncpa [#allocation3], 0 }
   0x5   :  { %12 = vsyncpa [#allocation3 + $0x1], 0 }
   0x6   :  { %13 = vsyncpa [#allocation6], 0 }
   0x7   :  { %15 = vsyncpa [#allocation6 + $0x1], 0 }
   0x8   :  { %16 = vsyncpa [#allocation9], 0 }
   0x9   :  { %17 = vsyncpa [#allocation4], 0 }
   0xa   :  { %19 = vsyncpa [#allocation4 + $0x1], 0  ;;  %s1169_s18 = smov 0   ;;  %s1171_s19 = smov 0  }
   0xb   :  { %s1173_s20 = smov 0   ;;  %s1175_s21 = smov 0  }
   0xc   :  { %s1177_s22 = smov 0   ;;  %s1179_s23 = smov 0  }
   0xd LB: > { %s1200_s24 = sadd.s32 4294967295, %s1127_s23   ;;  %s743_s25 = sadd.s32 4294967294, %s1127_s23   ;;  %s1127_s23 = sphi %s1179_s23, %s25_s23   ;;  %s1123_s22 = sphi %s1177_s22, %s1555_s22   ;;  %s1119_s21 = sphi %s1175_s21, %s1554_s21   ;;  %s1115_s20 = sphi %s1173_s20, %s1553_s20   ;;  %s1111_s19 = sphi %s1171_s19, %s1552_s19   ;;  %s1107_s18 = sphi %s1169_s18, %s1551_s18  }
   0xe   : > { %p59_p0 = scmp.ne.s32.totalorder %s1111_s19, %s1107_s18  ;;  %p1521_p1 = scmp.eq.s32.totalorder %s1200_s24, 0 }
   0xf   : > { %p182_p3 = scmp.eq.s32.totalorder %s743_s25, 1  ;;  %p744_p5 = scmp.ge.s32.totalorder %s1127_s23, 1 }
  0x10   : > { %p1209_p4 = por %p1521_p1, %p59_p0  ;;  %p189_p7 = scmp.lt.s32.totalorder %s1127_s23, 3 }
  0x11   : > { %p1214_p6 = por %p182_p3, %p59_p0  ;;  %s1129_s29 = smov [#allocation7]  }
  0x12   : > { %s1529_s26 = scalar_select %p1209_p4, 1, 0 }
  0x13   : > { %s1530_s27 = scalar_select %p1214_p6, 1, 0 }
  0x14   : > { %p1219_p8 = pnand %p744_p5, %p189_p7  ;;  %s202_s30 = sshll.u32 %s1129_s29, 4  ;;  %s203_s30 = int_to_ptr.vmem [resolvable:$true] %s202_s30 }
  0x15   : > { %s1130_s6 = smov [#allocation8]   ;;  %s1131_s9 = smov [#allocation10]  }
  0x16   : > { %s1531_s28 = scalar_select %p1219_p8, 1, 0 }
  0x17   : > { %p790_p10 = pneg %p1219_p8  ;;  %s213_s7 = sshll.u32 %s1130_s6, 4  ;;  %s1232_s7 = int_to_ptr.vmem [resolvable:$true] %s213_s7 }
  0x18   : > { %s224_s10 = sshll.u32 %s1131_s9, 4  ;;  %s1533_s2 = sld [smem:[#allocation18_spill]]  ;;  %s1234_s10 = int_to_ptr.vmem [resolvable:$true] %s224_s10 }
  0x19   : > { %p1228_p11 = pnand %p790_p10, %p1521_p1 }
  0x1b   : > { %p1244_p13 = pneg %p1228_p11 }
  0x1e   : > { %s889_s13 = scalar_lea.hbm %s1533_s2, 64 }
  0x1f   : > { %p890_p12 = scmp.ne.s32.totalorder %s1533_s2, %s889_s13  ;;  %p896_p5 = scmp.lt.u32.totalorder %s889_s13, %s1533_s2 }
  0x21   : > { %p892_p0 = pnand %p1244_p13, %p890_p12 }
  0x23   : > { %p893_p3 = pneg %p892_p0 }
  0x25   : > { %p898_p7 = pnand %p896_p5, %p893_p3 }
  0x27   : > { %901 = shalt.err (!%p898_p7)
}
  0x28   : > { %s902_s29 = scalar_lea.vmem %s203_s30, 64  ;;  %p910_p2 = scmp.lt.s32.totalorder %s203_s30, %s203_s30 }
  0x29   : > { %p903_p10 = scmp.ne.s32.totalorder %s203_s30, %s902_s29  ;;  %p911_p6 = scmp.lt.s32.totalorder %s902_s29, %s902_s29 }
  0x2b   : > { %p905_p9 = pnand %p903_p10, %p1244_p13  ;;  %p912_p4 = por %p911_p6, %p910_p2 }
  0x2d   : > { %p906_p1 = pneg %p905_p9 }
  0x2f   : > { %p913_p8 = pnand %p912_p4, %p906_p1 }
  0x31   : > { %916 = shalt.err (!%p913_p8)
}
  0x32   : > { %793 = dma.hbm_to_vmem [thread:$0]  (!%p1228_p11), %s1533_s2, 64, %s203_s30, [#allocation6]  }
  0x33   : > { %s1535_s3 = sld [smem:[#allocation19_spill]] }
  0x39   : > { %s917_s13 = scalar_lea.hbm %s1535_s3, 64 }
  0x3a   : > { %p918_p9 = scmp.ne.s32.totalorder %s1535_s3, %s917_s13  ;;  %p924_p1 = scmp.lt.u32.totalorder %s917_s13, %s1535_s3 }
  0x3c   : > { %p920_p12 = pnand %p918_p9, %p1244_p13 }
  0x3e   : > { %p921_p2 = pneg %p920_p12 }
  0x40   : > { %p926_p4 = pnand %p924_p1, %p921_p2 }
  0x42   : > { %929 = shalt.err (!%p926_p4)
}
  0x43   : > { %s930_s30 = scalar_lea.vmem %s1232_s7, 64  ;;  %p938_p3 = scmp.lt.s32.totalorder %s1232_s7, %s1232_s7 }
  0x44   : > { %p931_p6 = scmp.ne.s32.totalorder %s1232_s7, %s930_s30  ;;  %p939_p5 = scmp.lt.s32.totalorder %s930_s30, %s930_s30 }
  0x46   : > { %p933_p8 = pnand %p931_p6, %p1244_p13  ;;  %p940_p7 = por %p939_p5, %p938_p3 }
  0x48   : > { %p934_p0 = pneg %p933_p8 }
  0x4a   : > { %p941_p10 = pnand %p940_p7, %p934_p0 }
  0x4c   : > { %944 = shalt.err (!%p941_p10)
}
  0x4d   : > { %796 = dma.hbm_to_vmem [thread:$0]  (!%p1228_p11), %s1535_s3, 64, %s1232_s7, [#allocation9]  }
  0x4e   : > { %s1536_s4 = sld [smem:[#allocation20_spill]] }
  0x54   : > { %s945_s12 = scalar_lea.hbm %s1536_s4, 64 }
  0x55   : > { %p946_p9 = scmp.ne.s32.totalorder %s1536_s4, %s945_s12  ;;  %p952_p1 = scmp.lt.u32.totalorder %s945_s12, %s1536_s4 }
  0x57   : > { %p948_p12 = pnand %p946_p9, %p1244_p13 }
  0x59   : > { %p949_p2 = pneg %p948_p12 }
  0x5b   : > { %p954_p4 = pnand %p952_p1, %p949_p2 }
  0x5d   : > { %957 = shalt.err (!%p954_p4)
}
  0x5e   : > { %s958_s7 = scalar_lea.vmem %s1234_s10, 64  ;;  %p966_p3 = scmp.lt.s32.totalorder %s1234_s10, %s1234_s10 }
  0x5f   : > { %p959_p6 = scmp.ne.s32.totalorder %s1234_s10, %s958_s7  ;;  %p967_p5 = scmp.lt.s32.totalorder %s958_s7, %s958_s7 }
  0x61   : > { %p961_p8 = pnand %p959_p6, %p1244_p13  ;;  %p968_p7 = por %p967_p5, %p966_p3 }
  0x63   : > { %p962_p0 = pneg %p961_p8 }
  0x65   : > { %p969_p10 = pnand %p968_p7, %p962_p0 }
  0x67   : > { %972 = shalt.err (!%p969_p10)
}
  0x68   : > { %799 = dma.hbm_to_vmem [thread:$0]  (!%p1228_p11), %s1536_s4, 64, %s1234_s10, [#allocation9]  }
  0x69   : > { %s46_s16 = sadd.s32 1, %s1115_s20  ;;  %s37_s29 = sadd.s32 1, %s1123_s22 }
  0x6a   : > { %p53_p13 = scmp.ne.s32.totalorder %s1115_s20, %s1111_s19  ;;  %p39_p9 = scmp.ge.s32.totalorder %s37_s29, 2 }
  0x6b   : > { %p54_p12 = scmp.eq.s32.totalorder %s1127_s23, 0  ;;  %p1537_p2 = scmp.eq.s32.totalorder %s1200_s24, 1 }
  0x6c   : > { %p814_p4 = scmp.lt.s32.totalorder %s1127_s23, 2  ;;  %s1557_s29 = smov (%p39_p9, %s37_s29), 0 }
  0x6d   : > { %p1313_p1 = por %p1537_p2, %p53_p13  ;;  %1539 = sst [smem:[#allocation17_spill]] %s1557_s29 }
  0x6e   : > { %p55_p6 = por %p54_p12, %p53_p13  ;;  %s235_s6 = sand.u32 1, %s1115_s20  }
  0x6f   : > { %s1538_s8 = scalar_select %p1313_p1, 1, 0 }
  0x70   : > { %s41_s9 = ssub.s32 %s1123_s22, %s1557_s29  ;;  %s1323_s10 = sshll.u32 %s235_s6, 3 }
  0x71   : > { %p44_p11 = scmp.eq.s32.totalorder %s41_s9, 0  ;;  %s769_s11 = sshll.u32 %s1123_s22, 7 }
  0x72   : > { %s1332_s15 = scalar_lea.hbm %s1515_s0, %s769_s11  ;;  %s239_s17 = scalar_lea.vmem [#allocation2], %s1323_s10 }
  0x73   : > { %s1327_s12 = scalar_select %p44_p11, %s1115_s20, %s46_s16  }
  0x74   : > { %s249_s7 = sshll.u32 %s239_s17, 4  ;;  %p1339_p8 = pnand %p814_p4, %p55_p6  ;;  %s1335_s7 = int_to_ptr.vmem [resolvable:$true] %s249_s7 }
  0x75   : > { %s1346_s9 = scalar_lea.hbm %s1516_s1, %s769_s11  ;;  %s256_s13 = sand.u32 1, %s1127_s23  }
  0x76   : > { %s236_s14 = scalar_lea.sflag [#allocation3], %s235_s6  ;;  %s973_s2 = scalar_lea.hbm %s1332_s15, 128 }
  0x77   : > { %p974_p0 = scmp.ne.s32.totalorder %s1332_s15, %s973_s2  ;;  %p975_p3 = pneg %p1339_p8 }
  0x78   : > { %s978_s4 = scalar_lea.hbm %s1515_s0, 256  ;;  %p979_p10 = scmp.lt.u32.totalorder %s1332_s15, %s1515_s0 }
  0x79   : > { %p976_p5 = pnand %p975_p3, %p974_p0  ;;  %p980_p13 = scmp.lt.u32.totalorder %s978_s4, %s973_s2 }
  0x7a   : > { %p982_p12 = scmp.lt.u32.totalorder %s973_s2, %s1332_s15 }
  0x7b   : > { %p977_p7 = pneg %p976_p5  ;;  %p981_p9 = por %p980_p13, %p979_p10 }
  0x7d   : > { %p983_p2 = por %p982_p12, %p981_p9 }
  0x7f   : > { %p984_p4 = pnand %p983_p2, %p977_p7 }
  0x81   : > { %987 = shalt.err (!%p984_p4)
}
  0x82   : > { %s988_s6 = scalar_lea.vmem %s1335_s7, 128  ;;  %s1132_s3 = smov [#allocation2]  }
  0x83   : > { %p989_p6 = scmp.ne.s32.totalorder %s1335_s7, %s988_s6  ;;  %s993_s11 = sshll.u32 %s1132_s3, 4  ;;  %s994_s11 = int_to_ptr.vmem [resolvable:$false] %s993_s11 }
  0x84   : > { %s995_s29 = scalar_lea.vmem %s994_s11, 256  ;;  %p996_p5 = scmp.lt.s32.totalorder %s1335_s7, %s994_s11 }
  0x85   : > { %p991_p11 = pnand %p989_p6, %p975_p3  ;;  %p997_p10 = scmp.lt.s32.totalorder %s995_s29, %s988_s6 }
  0x87   : > { %p992_p0 = pneg %p991_p11  ;;  %p998_p13 = por %p997_p10, %p996_p5 }
  0x89   : > { %p999_p9 = pnand %p998_p13, %p992_p0 }
  0x8b   : > { %1002 = shalt.err (!%p999_p9)
}
  0x8c   : > { %803 = dma.hbm_to_vmem [thread:$0]  (!%p1339_p8), %s1332_s15, 128, %s1335_s7, %s236_s14  }
  0x8d   : > { %s260_s2 = scalar_lea.vmem [#allocation5], %s1323_s10  ;;  %s257_s16 = scalar_lea.sflag [#allocation6], %s256_s13 }
  0x8e   : > { %s270_s4 = sshll.u32 %s260_s2, 4  ;;  %s1003_s17 = scalar_lea.hbm %s1346_s9, 128  ;;  %s271_s4 = int_to_ptr.vmem [resolvable:$true] %s270_s4 }
  0x8f   : > { %p1004_p7 = scmp.ne.s32.totalorder %s1346_s9, %s1003_s17  ;;  %s1008_s3 = scalar_lea.hbm %s1516_s1, 256 }
  0x90   : > { %p1009_p4 = scmp.lt.u32.totalorder %s1346_s9, %s1516_s1  ;;  %p1010_p6 = scmp.lt.u32.totalorder %s1008_s3, %s1003_s17 }
  0x91   : > { %p1006_p12 = pnand %p1004_p7, %p975_p3  ;;  %p1012_p0 = scmp.lt.u32.totalorder %s1003_s17, %s1346_s9 }
  0x92   : > { %p1011_p11 = por %p1010_p6, %p1009_p4 }
  0x93   : > { %p1007_p2 = pneg %p1006_p12 }
  0x94   : > { %p1013_p5 = por %p1012_p0, %p1011_p11 }
  0x96   : > { %p1014_p10 = pnand %p1013_p5, %p1007_p2 }
  0x98   : > { %1017 = shalt.err (!%p1014_p10)
}
  0x99   : > { %s1018_s10 = scalar_lea.vmem %s271_s4, 128  ;;  %s1133_s15 = smov [#allocation5]  }
  0x9a   : > { %p1019_p13 = scmp.ne.s32.totalorder %s271_s4, %s1018_s10  ;;  %s1023_s7 = sshll.u32 %s1133_s15, 4  ;;  %s1024_s7 = int_to_ptr.vmem [resolvable:$false] %s1023_s7 }
  0x9b   : > { %s1025_s13 = scalar_lea.vmem %s1024_s7, 256  ;;  %p1026_p12 = scmp.lt.s32.totalorder %s271_s4, %s1024_s7 }
  0x9c   : > { %p1021_p9 = pnand %p1019_p13, %p975_p3  ;;  %p1027_p1 = scmp.lt.s32.totalorder %s1025_s13, %s1018_s10 }
  0x9e   : > { %p1022_p7 = pneg %p1021_p9  ;;  %p1028_p4 = por %p1027_p1, %p1026_p12 }
  0xa0   : > { %p1029_p6 = pnand %p1028_p4, %p1022_p7 }
  0xa2   : > { %1032 = shalt.err (!%p1029_p6)
}
  0xa3   : > { %806 = dma.hbm_to_vmem [thread:$0]  (!%p1339_p8), %s1346_s9, 128, %s271_s4, %s257_s16  }
  0xa4   : > { %p1541_p2 = scmp.ne.s32.totalorder %s1531_s28, 0 }
  0xa5   : > { %s1399_s14 = sand.u32 (!%p1541_p2), 1, %s1111_s19   ;;  %p1542_p1 = scmp.ne.s32.totalorder (!%p1541_p2), %s1529_s26, 0 }
  0xa6   : > { %279 = sbr.rel (%p1541_p2) target bundleno = 384 (0x180), region = 40  ;;  %s1402_s2 = sshll.u32 (!%p1541_p2), %s1399_s14, 3 }
  0xa7   : > { %s282_s17 = scalar_lea.sflag (!%p1541_p2), [#allocation3], %s1399_s14  ;;  %s285_s30 = scalar_lea.vmem (!%p1541_p2), [#allocation2], %s1402_s2 }
  0xad   : > { %1086 = dma.done.wait (%p1542_p1), %s282_s17, 128  }
  0xae   : > { %1088 = vsyncadd (%p1542_p1), %s282_s17, 4294967168  ;;  %s290_s28 = sand.u32 1, %s1200_s24   ;;  %s294_s9 = scalar_lea.vmem [#allocation5], %s1402_s2 }
  0xaf   : > { %s291_s25 = scalar_lea.sflag [#allocation6], %s290_s28 }
  0xb0   : > { %1090 = dma.done.wait (%p1542_p1), %s291_s25, 128  }
  0xb1   : > { %1092 = vsyncadd (%p1542_p1), %s291_s25, 4294967168  ;;  %p1543_p8 = scmp.eq.s32.totalorder %s1200_s24, 0 }
  0xb3   : > { %1094 = dma.done.wait (%p1543_p8), [#allocation6], 64   ;;  %p1544_p3 = pmov %p1543_p8 }
  0xb5   : > { %1096 = vsyncadd (%p1544_p3), [#allocation6], 4294967232  ;;  %p1545_p11 = pmov %p1544_p3 }
  0xb6   : > { %p1546_p0 = pmov %p1544_p3 }
  0xb7   : > { %1098 = dma.done.wait (%p1545_p11), [#allocation9], 128  }
  0xb8   : > { %1100 = vsyncadd (%p1546_p0), [#allocation9], 4294967168  ;;  %v1134_v0 = vmov 0   ;;  %v378_v1 = vld [vmem:[#allocation8] sm:$0xf]  ;;  %v1135_v4 = vmov 1   ;;  %v356_v7 = vlaneseq }
  0xb9   : > { %875 = vset.pattern.permute.xlu1 %v1134_v0  ;;  %874 = vset.pattern.permute.xlu0 %v1134_v0  ;;  %v349_v2 = vld [vmem:[#allocation7] sm:$0xf]  ;;  %v343_v3 = vld [vmem:[#allocation10] sm:$0xf]  ;;  %v1136_v5 = vmov 2   ;;  %v1137_v6 = vmov 3  }
  0xba   : > { %381 = vperm.xlu1 %875, %v378_v1   ;;  %352 = vperm.xlu0 %874, %v349_v2   ;;  %v1424_v8 = vshrl.u32 %v356_v7, 7  ;;  %v1428_v9 = vld [vmem:[%s285_s30] sm:$0xff]  ;;  %v1436_v14 = vld [vmem:[%s294_s9] sm:$0xff]  ;;  %s771_s24 = sshll.u32 %s1119_s21, 7  ;;  %s337_s26 = scalar_lea.vmem [#allocation11], %s1402_s2 }
  0xbb   : > { %s604_s4 = sshll.u32 %s337_s26, 4  ;;  %s1466_s3 = scalar_lea.hbm %s1520_s5, %s771_s24  ;;  %s1468_s4 = int_to_ptr.vmem [resolvable:$true] %s604_s4 }
  0xbc   : > { %v358_v10 = vsub.s32 0, %v1424_v8  ;;  %v362_v11 = vsub.s32 4, %v1424_v8  ;;  %v413_v15 = vsub.s32 1, %v1424_v8  ;;  %v417_v16 = vsub.s32 5, %v1424_v8  ;;  %s588_s11 = scalar_lea.sflag [#allocation4], %s1399_s14  ;;  %s1033_s29 = scalar_lea.vmem %s1468_s4, 128 }
  0xbd   : > { %v465_v17 = vsub.s32 2, %v1424_v8  ;;  %v469_v18 = vsub.s32 6, %v1424_v8  ;;  %v517_v37 = vsub.s32 3, %v1424_v8  ;;  %v521_v38 = vsub.s32 7, %v1424_v8  ;;  %p1034_p5 = scmp.ne.s32.totalorder %s1468_s4, %s1033_s29  ;;  %p1547_p10 = scmp.ne.s32.totalorder %s1538_s8, 0 }
  0xbe   : > { %876 = vset.pattern.permute.xlu1 %v1135_v4  ;;  %346 = vperm.xlu0 %874, %v343_v3   ;;  %v359_v12 = vrot.slane %v1428_v9, %v358_v10  ;;  %v363_v13 = vrot.slane %v1428_v9, %v362_v11  ;;  %v388_v19 = vrot.slane %v1436_v14, %v358_v10  ;;  %s1138_s21 = smov [#allocation11]  }
  0xbf   : > { %408 = vperm.xlu1 %876, %v349_v2   ;;  %v392_v20 = vrot.slane %v1436_v14, %v362_v11  ;;  %v414_v23 = vrot.slane %v1428_v9, %v413_v15  ;;  %v418_v24 = vrot.slane %v1428_v9, %v417_v16  ;;  %v440_v27 = vrot.slane %v1436_v14, %v413_v15  ;;  %p1035_p13 = pnand %p1034_p5, %p1547_p10  ;;  %s1037_s10 = sshll.u32 %s1138_s21, 4  ;;  %s1038_s10 = int_to_ptr.vmem [resolvable:$false] %s1037_s10 }
  0xc0   : > { %v369_v21 = vrot.slane %v359_v12, %v358_v10  ;;  %v373_v22 = vrot.slane %v363_v13, %v358_v10  ;;  %v444_v28 = vrot.slane %v1436_v14, %v417_v16  ;;  %v466_v29 = vrot.slane %v1428_v9, %v465_v17  ;;  %s1039_s15 = scalar_lea.vmem %s1038_s10, 256  ;;  %p1040_p7 = scmp.lt.s32.totalorder %s1468_s4, %s1038_s10 }
  0xc1   : > { %v470_v30 = vrot.slane %v1428_v9, %v469_v18  ;;  %v398_v31 = vrot.slane %v388_v19, %v358_v10  ;;  %v402_v32 = vrot.slane %v392_v20, %v358_v10  ;;  %v424_v35 = vrot.slane %v414_v23, %v413_v15  ;;  %p1036_p9 = pneg %p1035_p13  ;;  %p1041_p12 = scmp.lt.s32.totalorder %s1039_s15, %s1033_s29 }
  0xc2   : > { %877 = vset.pattern.permute.xlu0 %v1135_v4  ;;  %v428_v36 = vrot.slane %v418_v24, %v413_v15  ;;  %v450_v40 = vrot.slane %v440_v27, %v413_v15  ;;  %v454_v41 = vrot.slane %v444_v28, %v413_v15  ;;  %v476_v42 = vrot.slane %v466_v29, %v465_v17 }
  0xc3   : > { %878 = vset.pattern.permute.xlu1 %v1136_v5  ;;  %434 = vperm.xlu0 %877, %v378_v1   ;;  %v480_v43 = vrot.slane %v470_v30, %v465_v17  ;;  %v492_v51 = vrot.slane %v1436_v14, %v465_v17  ;;  %v496_v52 = vrot.slane %v1436_v14, %v469_v18  ;;  %p1042_p4 = por %p1041_p12, %p1040_p7 }
  0xc4   : > { %460 = vperm.xlu1 %878, %v349_v2   ;;  %v518_v55 = vrot.slane %v1428_v9, %v517_v37  ;;  %v522_v56 = vrot.slane %v1428_v9, %v521_v38  ;;  %v544_v7 = vrot.slane %v1436_v14, %v517_v37  ;;  %v548_v8 = vrot.slane %v1436_v14, %v521_v38 }
  0xc5   : > { %v502_v63 = vrot.slane %v492_v51, %v465_v17  ;;  %v506_v0 = vrot.slane %v496_v52, %v465_v17  ;;  %p1043_p6 = pnand %p1042_p4, %p1036_p9 }
  0xc6   : > { %v528_v3 = vrot.slane %v518_v55, %v517_v37  ;;  %v532_v4 = vrot.slane %v522_v56, %v517_v37  ;;  %v554_v20 = vrot.slane %v544_v7, %v517_v37  ;;  %v558_v17 = vrot.slane %v548_v8, %v517_v37 }
  0xc7   : > { %879 = vset.pattern.permute.xlu0 %v1137_v6 }
  0xc8   : > { %486 = vperm.xlu1 %878, %v378_v1   ;;  %512 = vperm.xlu0 %879, %v349_v2  }
  0xcc   : > { %880 = vset.pattern.permute.xlu1 %v1137_v6 }
  0xcd   : > { %538 = vperm.xlu1 %880, %v378_v1  }
 0x139   : > { %v382_v25 = vpop.permute.xlu1 %381  ;;  %v353_v26 = vpop.permute.xlu0 %352 }
 0x13a   : > { %v374_v33 = vmul.f32 %v369_v21, %v353_v26  ;;  %v375_v34 = vmul.f32 %v373_v22, %v353_v26  ;;  %v403_v44 = vmul.f32 %v398_v31, %v382_v25  ;;  %v404_v45 = vmul.f32 %v402_v32, %v382_v25 }
 0x13d   : > { %v347_v39 = vpop.permute.xlu0 %346 }
 0x13e   : > { %v376_v46 = vadd.f32 %v374_v33, %v347_v39  ;;  %v377_v47 = vadd.f32 %v375_v34, %v347_v39  ;;  %v409_v48 = vpop.permute.xlu1 %408 }
 0x13f   : > { %v429_v49 = vmul.f32 %v424_v35, %v409_v48  ;;  %v430_v50 = vmul.f32 %v428_v36, %v409_v48  ;;  %v575_v36 = vsub.f32 %v1436_v14, %v1428_v9 }
 0x140   : > { %v405_v53 = vadd.f32 %v403_v44, %v376_v46  ;;  %v406_v54 = vadd.f32 %v404_v45, %v377_v47 }
 0x141   : > { %v577_v37 = vcombine.high %v575_v36, %v575_v36 }
 0x142   : > { %v431_v57 = vadd.f32 %v429_v49, %v405_v53  ;;  %v432_v58 = vadd.f32 %v430_v50, %v406_v54  ;;  %v435_v59 = vpop.permute.xlu0 %434 }
 0x143   : > { %v455_v60 = vmul.f32 %v450_v40, %v435_v59  ;;  %v456_v61 = vmul.f32 %v454_v41, %v435_v59  ;;  %v461_v62 = vpop.permute.xlu1 %460 }
 0x144   : > { %v481_v1 = vmul.f32 %v476_v42, %v461_v62  ;;  %v482_v2 = vmul.f32 %v480_v43, %v461_v62 }
 0x145   : > { %v457_v5 = vadd.f32 %v455_v60, %v431_v57  ;;  %v458_v6 = vadd.f32 %v456_v61, %v432_v58 }
 0x147   : > { %v483_v10 = vadd.f32 %v481_v1, %v457_v5  ;;  %v484_v11 = vadd.f32 %v482_v2, %v458_v6  ;;  %v487_v12 = vpop.permute.xlu1 %486  ;;  %v513_v13 = vpop.permute.xlu0 %512 }
 0x148   : > { %v507_v15 = vmul.f32 %v502_v63, %v487_v12  ;;  %v508_v16 = vmul.f32 %v506_v0, %v487_v12  ;;  %v533_v18 = vmul.f32 %v528_v3, %v513_v13  ;;  %v534_v19 = vmul.f32 %v532_v4, %v513_v13 }
 0x14a   : > { %v509_v21 = vadd.f32 %v507_v15, %v483_v10  ;;  %v510_v22 = vadd.f32 %v508_v16, %v484_v11 }
 0x14c   : > { %v535_v23 = vadd.f32 %v533_v18, %v509_v21  ;;  %v536_v24 = vadd.f32 %v534_v19, %v510_v22  ;;  %v539_v25 = vpop.permute.xlu1 %538 }
 0x14d   : > { %v559_v26 = vmul.f32 %v554_v20, %v539_v25  ;;  %v560_v27 = vmul.f32 %v558_v17, %v539_v25 }
 0x14f   : > { %v561_v28 = vadd.f32 %v559_v26, %v535_v23  ;;  %v562_v29 = vadd.f32 %v560_v27, %v536_v24 }
 0x151   : > { %v762_v30 = vmul.f32 -1.442695, %v561_v28  ;;  %v763_v31 = vmul.f32 -1.442695, %v562_v29 }
 0x153   : > { %881 = vpow2.f32 %v762_v30 }
 0x154   : > { %883 = vpow2.f32 %v763_v31 }
 0x15d   : > { %v882_v32 = vpop.eup %881 }
 0x15e   : > { %v884_v33 = vpop.eup %883  ;;  %v569_v34 = vadd.f32 1.0, %v882_v32 }
 0x15f   : > { %v570_v35 = vadd.f32 1.0, %v884_v33 }
 0x160   : > { %885 = vrcp.f32 %v569_v34 }
 0x161   : > { %887 = vrcp.f32 %v570_v35 }
 0x16a   : > { %v886_v38 = vpop.eup %885 }
 0x16b   : > { %v888_v39 = vpop.eup %887  ;;  %v579_v40 = vmul.f32 %v886_v38, %v575_v36 }
 0x16c   : > { %v580_v41 = vmul.f32 %v888_v39, %v577_v37 }
 0x16e   : > { %v583_v42 = vcombine.low %v579_v40, %v580_v41 }
 0x170   : > { %v585_v43 = vadd.f32 %v583_v42, %v1428_v9 }
 0x172   : > { %586 = vst [vmem:[%s337_s26] sm:$0xff] %v585_v43 }
 0x173   : > { %1046 = shalt.err (!%p1043_p6)
}
 0x174   : > { %s1047_s7 = scalar_lea.hbm %s1466_s3, 128  ;;  %s1051_s2 = scalar_lea.hbm %s1520_s5, 256 }
 0x175   : > { %p1048_p2 = scmp.ne.s32.totalorder %s1466_s3, %s1047_s7  ;;  %p1052_p3 = scmp.lt.u32.totalorder %s1466_s3, %s1520_s5 }
 0x176   : > { %p1053_p11 = scmp.lt.u32.totalorder %s1051_s2, %s1047_s7  ;;  %p1055_p5 = scmp.lt.u32.totalorder %s1047_s7, %s1466_s3 }
 0x177   : > { %p1049_p1 = pnand %p1048_p2, %p1547_p10 }
 0x178   : > { %p1054_p0 = por %p1053_p11, %p1052_p3 }
 0x179   : > { %p1050_p8 = pneg %p1049_p1 }
 0x17a   : > { %p1056_p13 = por %p1055_p5, %p1054_p0 }
 0x17c   : > { %p1057_p9 = pnand %p1056_p13, %p1050_p8 }
 0x17e   : > { %1060 = shalt.err (!%p1057_p9)
}
 0x17f   : > { %788 = dma.vmem_to_hbm [thread:$0]  (%p1547_p10), %s1468_s4, 128, %s1466_s3, %s588_s11  }
 0x180 PF: > { %s616_s28 = sand.u32 1, %s1107_s18   ;;  %p1548_p7 = scmp.ne.s32.totalorder %s1530_s27, 0 }
 0x181   : > { %p1549_p12 = scmp.ge.s32.totalorder %s1127_s23, 2  ;;  %s617_s25 = scalar_lea.sflag [#allocation4], %s616_s28 }
 0x183   : > { %p808_p4 = pnand %p1549_p12, %p1548_p7 }
 0x185   : > { %1102 = dma.done.wait (!%p808_p4), %s617_s25, 128  }
 0x186   : > { %1104 = vsyncadd (!%p808_p4), %s617_s25, 4294967168  ;;  %s25_s23 = sadd.s32 1, %s1127_s23   ;;  %s1550_s8 = sld [smem:[#allocation17_spill]] }
 0x187   : > { %p22_p6 = scmp.ge.s32.totalorder %s25_s23, 4   ;;  %s1551_s18 = smov %s1111_s19 }
 0x188   : > { %s1552_s19 = smov %s1115_s20  ;;  %s1553_s20 = smov %s1327_s12 }
 0x189   : > { %s1554_s21 = smov %s1123_s22  ;;  %24 = sbr.rel (!%p22_p6) target bundleno = 13 (0xd), region = 110 }
 0x18c   : > { %s1555_s22 = smov %s1550_s8 }
 0x190   :  { %622 = vsyncpa [#allocation3], 1 }
 0x191   :  { %624 = vsyncpa [#allocation3 + $0x1], 1 }
 0x192   :  { %625 = vsyncpa [#allocation6], 1 }
 0x193   :  { %627 = vsyncpa [#allocation6 + $0x1], 1 }
 0x194   :  { %628 = vsyncpa [#allocation9], 1 }
 0x195   :  { %629 = vsyncpa [#allocation4], 1 }
 0x196   :  { %631 = vsyncpa [#allocation4 + $0x1], 1 }

</bundles_post_ra>
